<compile_context>
chip_gen: v7x
topology: tpu7x:2x2x1
jax: 0.10.0
libtpu: 0.0.40
codegen_flags: <defaults>
</compile_context>

<pallas_src>
import functools

import jax
import jax.numpy as jnp
from jax.experimental import pallas as pl
from jax.experimental.pallas import tpu as pltpu

# NOTE: -0.1 is an unusually high log-sigma floor but matches the original
# module's constants used by the previous (verified) implementation.
LOG_SIGMA_MIN = -0.1
LOG_SIGMA_MAX = 5.0
_SQRT1_2 = 0.7071067811865475


def _gelu(v):
    # exact (erf-based) GELU, matching torch.nn.functional.gelu default.
    # GELU(0) == 0, which the zero-padding scheme in pack_params relies on.
    return 0.5 * v * (1.0 + jax.lax.erf(v * _SQRT1_2))


def _round_up(x, m):
    return m * ((x + m - 1) // m)


# -----------------------------------------------------------------------------
# Kernel
# -----------------------------------------------------------------------------
def critic_kernel(s_ref, a_ref, w_in_ref, w_tr_ref, w_h1_ref, w_h2_ref,
                  w_h3_ref, b_ref, o_ref, *, state_dim, action_dim, n_pad,
                  fused):
    f32 = jnp.float32

    def mm(v, w):
        # downcast only the matmul inputs (possibly bf16 weights), accumulate f32
        return jnp.dot(v.astype(w.dtype), w, preferred_element_type=f32)

    s = s_ref[...]                                   # (bb, state_dim)  f32
    a = a_ref[...]                                   # (bb, action_dim) f32

    # ---- trunk layer 1: split W1 into state / action row blocks (no concat).
    # Ref-level static slices pull only the logical rows of each plane.
    h = (mm(s, w_in_ref[0, :state_dim, :])
         + mm(a, w_in_ref[1, :action_dim, :])
         + b_ref[0, :, :n_pad])
    h = _gelu(h)

    # ---- trunk layers 2-3
    for l in range(2):
        h = _gelu(mm(h, w_tr_ref[l]) + b_ref[1 + l, :, :n_pad])

    # ---- head layer 1: mu | log_sigma branches side by side, single dot
    h1 = _gelu(mm(h, w_h1_ref[...]) + b_ref[3, :, :])

    if fused:
        # 2N <= 128: block-diag fusion halves the MXU work for head layer 2.
        h2 = _gelu(mm(h1, w_h2_ref[0]) + b_ref[4, :, :])
        out = mm(h2, w_h3_ref[0]) + b_ref[6, :, :128]
    else:
        # 2N > 128: two N-wide dots (128-aligned lane splits) avoid the
        # 2x zero-FLOPs of a block-diagonal (2N x 2N) plane.
        hm = _gelu(mm(h1[:, :n_pad], w_h2_ref[0]) + b_ref[4, :, :n_pad])
        hs = _gelu(mm(h1[:, n_pad:], w_h2_ref[1]) + b_ref[5, :, :n_pad])
        out = mm(hm, w_h3_ref[0]) + mm(hs, w_h3_ref[1]) + b_ref[6, :, :128]

    # Lane-dense store: col 0 = mu (raw), col 1 = sigma = exp(clip(log_sigma)),
    # remaining 126 lanes are junk (sliced away in the wrapper).
    col = jax.lax.broadcasted_iota(jnp.int32, out.shape, 1)
    sig = jnp.exp(jnp.clip(out, LOG_SIGMA_MIN, LOG_SIGMA_MAX))
    o_ref[...] = jnp.where(col == 1, sig, out).astype(o_ref.dtype)


# -----------------------------------------------------------------------------
# Parameter packing (do this ONCE outside the training/eval loop and reuse)
# -----------------------------------------------------------------------------
def pack_params(params, state_dim, action_dim, layer_neurons):
    """Pack the 18 tensors into per-width slabs.

    Correctness of the padding relies on: padded weight rows/cols are zero,
    padded bias lanes are zero, and GELU(0) == 0, so padded lanes stay exactly
    zero through the whole network and results match the unpadded math.
    """
    N = layer_neurons
    Npad = _round_up(max(N, 2), 128)          # trunk / per-branch width
    fused = (2 * N) <= Npad                   # both head branches fit 128 lanes
    Hpad = Npad if fused else 2 * Npad        # head-L1 output width
    INpad = _round_up(max(state_dim, action_dim, 1), 8)
    s_col = N if fused else Npad              # lane offset of the sigma branch

    W_in = jnp.zeros((2, INpad, Npad), jnp.float32)           # W1 split rows
    W_in = W_in.at[0, :state_dim, :N].set(params["w1"][:state_dim, :])
    W_in = W_in.at[1, :action_dim, :N].set(params["w1"][state_dim:, :])

    W_tr = jnp.zeros((2, Npad, Npad), jnp.float32)            # W2, W3
    W_tr = W_tr.at[0, :N, :N].set(params["w2"])
    W_tr = W_tr.at[1, :N, :N].set(params["w3"])

    W_h1 = jnp.zeros((Npad, Hpad), jnp.float32)               # [wm1 | ws1]
    W_h1 = W_h1.at[:N, :N].set(params["wm1"])
    W_h1 = W_h1.at[:N, s_col:s_col + N].set(params["ws1"])

    if fused:
        W_h2 = jnp.zeros((1, Npad, Npad), jnp.float32)        # blockdiag
        W_h2 = W_h2.at[0, :N, :N].set(params["wm2"])
        W_h2 = W_h2.at[0, N:2 * N, N:2 * N].set(params["ws2"])
        W_h3 = jnp.zeros((1, Npad, 128), jnp.float32)         # col0=mu col1=ls
        W_h3 = W_h3.at[0, :N, 0:1].set(params["wm3"])
        W_h3 = W_h3.at[0, N:2 * N, 1:2].set(params["ws3"])
    else:
        W_h2 = jnp.zeros((2, Npad, Npad), jnp.float32)        # wm2, ws2
        W_h2 = W_h2.at[0, :N, :N].set(params["wm2"])
        W_h2 = W_h2.at[1, :N, :N].set(params["ws2"])
        W_h3 = jnp.zeros((2, Npad, 128), jnp.float32)
        W_h3 = W_h3.at[0, :N, 0:1].set(params["wm3"])
        W_h3 = W_h3.at[1, :N, 1:2].set(params["ws3"])

    Bias = jnp.zeros((7, 1, Hpad), jnp.float32)

    def put_b(Bacc, row, col, b):
        b = b.reshape(-1)
        return Bacc.at[row, 0, col:col + b.shape[0]].set(b)

    Bias = put_b(Bias, 0, 0, params["b1"])
    Bias = put_b(Bias, 1, 0, params["b2"])
    Bias = put_b(Bias, 2, 0, params["b3"])
    Bias = put_b(Bias, 3, 0, params["bm1"])
    Bias = put_b(Bias, 3, s_col, params["bs1"])
    if fused:
        Bias = put_b(Bias, 4, 0, params["bm2"])
        Bias = put_b(Bias, 4, N, params["bs2"])
    else:
        Bias = put_b(Bias, 4, 0, params["bm2"])
        Bias = put_b(Bias, 5, 0, params["bs2"])
    Bias = put_b(Bias, 6, 0, params["bm3"])
    Bias = put_b(Bias, 6, 1, params["bs3"])

    meta = dict(n=N, n_pad=Npad, h_pad=Hpad, fused=fused)
    return (W_in, W_tr, W_h1, W_h2, W_h3, Bias), meta


# -----------------------------------------------------------------------------
# Batch tiling (generation-aware)
# -----------------------------------------------------------------------------
def _min_grid_steps():
    """>= 2 grid steps only on 2-TensorCore chips (v7x); on single-TC chips
    (v5e/v6e) extra grid steps are pure serial overhead (~0.35us each)."""
    try:
        kind = jax.devices()[0].device_kind.lower()
        if "v7" in kind:
            return 2
    except Exception:
        pass
    return 1


def _pick_block_b(B, *, min_steps=1, max_block=1024):
    """Largest multiple-of-8 divisor of B (<= max_block) that leaves at least
    `min_steps` grid steps; falls back to the whole batch as one block."""
    if B % 8 != 0:
        return B
    divs = [d for d in range(8, min(B, max_block) + 1, 8) if B % d == 0]
    if not divs:
        return B
    ok = [d for d in divs if B // d >= min_steps]
    return max(ok) if ok else max(divs)


# -----------------------------------------------------------------------------
# Wrapper
# -----------------------------------------------------------------------------
def distributional_critic_forward(state, action, params, *, block_b=None,
                                  matmul_dtype=jnp.float32, packed=None):
    """state: (B, state_dim), action: (B, action_dim) -> (mu (B,1), sigma (B,1)).

    matmul_dtype=jnp.bfloat16 halves weight DMA/VMEM and uses the bf16 MXU on
    every TPU generation (v5e included); accumulation and all elementwise work
    (GELU / clip / exp) stay float32.
    """
    B, state_dim = state.shape
    Ba, action_dim = action.shape
    assert B == Ba
    layer_neurons = params["w2"].shape[0]

    # NOTE: in real use, call pack_params once outside the loop and pass `packed`.
    if packed is None:
        packed = pack_params(params, state_dim, action_dim, layer_neurons)
    (W_in, W_tr, W_h1, W_h2, W_h3, Bias), meta = packed
    if matmul_dtype != jnp.float32:
        W_in, W_tr, W_h1, W_h2, W_h3 = [
            w.astype(matmul_dtype) for w in (W_in, W_tr, W_h1, W_h2, W_h3)]

    if block_b is None:
        block_b = _pick_block_b(B, min_steps=_min_grid_steps())
    assert B % block_b == 0
    grid = (B // block_b,)

    kernel = functools.partial(
        critic_kernel, state_dim=state_dim, action_dim=action_dim,
        n_pad=meta["n_pad"], fused=meta["fused"])

    # Weight / bias slabs: whole-array VMEM residents -> copied in once,
    # single-buffered (no per-step pipelining, no double-buffer VMEM cost).
    def _vmem_spec():
        return pl.BlockSpec(memory_space=pltpu.MemorySpace.VMEM)

    out = pl.pallas_call(
        kernel,
        grid=grid,
        in_specs=[
            pl.BlockSpec((block_b, state_dim), lambda i: (i, 0)),
            pl.BlockSpec((block_b, action_dim), lambda i: (i, 0)),
            _vmem_spec(),   # W_in   (2, INpad, Npad)
            _vmem_spec(),   # W_tr   (2, Npad, Npad)
            _vmem_spec(),   # W_h1   (Npad, Hpad)
            _vmem_spec(),   # W_h2   (1|2, Npad, Npad)
            _vmem_spec(),   # W_h3   (1|2, Npad, 128)
            _vmem_spec(),   # Bias   (7, 1, Hpad)
        ],
        # lane-dense output tile: full 128 lanes -> unmasked stores
        out_specs=pl.BlockSpec((block_b, 128), lambda i: (i, 0)),
        out_shape=jax.ShapeDtypeStruct((B, 128), jnp.float32),
        compiler_params=pltpu.CompilerParams(
            dimension_semantics=("parallel",),
            vmem_limit_bytes=64 * 1024 * 1024,
        ),
    )(state, action, W_in, W_tr, W_h1, W_h2, W_h3, Bias)

    return out[:, 0:1], out[:, 1:2]


# -----------------------------------------------------------------------------
# Init + pure-JAX reference
# -----------------------------------------------------------------------------
def init_params(key, state_dim, action_dim, layer_neurons):
    """Deterministic init mimicking torch.nn.Linear (uniform +-1/sqrt(fan_in)).
    Weights stored as (in_features, out_features)."""
    dims = [
        ("w1", "b1", state_dim + action_dim, layer_neurons),
        ("w2", "b2", layer_neurons, layer_neurons),
        ("w3", "b3", layer_neurons, layer_neurons),
        ("wm1", "bm1", layer_neurons, layer_neurons),
        ("wm2", "bm2", layer_neurons, layer_neurons),
        ("wm3", "bm3", layer_neurons, 1),
        ("ws1", "bs1", layer_neurons, layer_neurons),
        ("ws2", "bs2", layer_neurons, layer_neurons),
        ("ws3", "bs3", layer_neurons, 1),
    ]
    params = {}
    for wname, bname, fan_in, fan_out in dims:
        key, kw, kb = jax.random.split(key, 3)
        bound = 1.0 / jnp.sqrt(float(fan_in))
        params[wname] = jax.random.uniform(
            kw, (fan_in, fan_out), jnp.float32, -bound, bound)
        params[bname] = jax.random.uniform(
            kb, (1, fan_out), jnp.float32, -bound, bound)
    return params


def reference_forward(state, action, params):
    """Pure-JAX reference for sanity checking."""
    x = jnp.concatenate([state, action], axis=1)

    def lin(v, w, b):
        return v @ w + b

    h = jax.nn.gelu(lin(x, params["w1"], params["b1"]), approximate=False)
    h = jax.nn.gelu(lin(h, params["w2"], params["b2"]), approximate=False)
    h = jax.nn.gelu(lin(h, params["w3"], params["b3"]), approximate=False)
    mu = jax.nn.gelu(lin(h, params["wm1"], params["bm1"]), approximate=False)
    mu = jax.nn.gelu(lin(mu, params["wm2"], params["bm2"]), approximate=False)
    mu = lin(mu, params["wm3"], params["bm3"])
    ls = jax.nn.gelu(lin(h, params["ws1"], params["bs1"]), approximate=False)
    ls = jax.nn.gelu(lin(ls, params["ws2"], params["bs2"]), approximate=False)
    ls = lin(ls, params["ws3"], params["bs3"])
    ls = jnp.clip(ls, LOG_SIGMA_MIN, LOG_SIGMA_MAX)
    return mu, jnp.exp(ls)


# -----------------------------------------------------------------------------
# Self-test
# -----------------------------------------------------------------------------
if __name__ == "__main__":
    def run_case(B, state_dim, action_dim, layer_neurons, seed):
        key = jax.random.PRNGKey(seed)
        key, ks, ka, kp = jax.random.split(key, 4)
        state = jax.random.normal(ks, (B, state_dim), jnp.float32)
        action = jax.random.normal(ka, (B, action_dim), jnp.float32)
        params = init_params(kp, state_dim, action_dim, layer_neurons)

        # exact f32 path
        mu, sigma = distributional_critic_forward(state, action, params)
        jax.block_until_ready((mu, sigma))
        mu_ref, sigma_ref = reference_forward(state, action, params)
        assert mu.shape == (B, 1) and sigma.shape == (B, 1)
        assert jnp.allclose(mu, mu_ref, atol=1e-5, rtol=1e-5)
        assert jnp.allclose(sigma, sigma_ref, atol=1e-5, rtol=1e-5)

        # bf16-MXU path: f32 accumulation + f32 elementwise -> loose tolerance.
        mu_bf, sigma_bf = distributional_critic_forward(
            state, action, params, matmul_dtype=jnp.bfloat16)
        jax.block_until_ready((mu_bf, sigma_bf))
        assert jnp.allclose(mu_bf, mu_ref, atol=0.1, rtol=0.1)
        assert jnp.allclose(sigma_bf, sigma_ref, atol=0.1, rtol=0.1)

    # Small shapes consistent with the module.
    # N=32 exercises the fused-head path (2N <= 128),
    # N=128 exercises the split-head path (2N > 128).
    run_case(B=16, state_dim=24, action_dim=8, layer_neurons=32, seed=0)
    run_case(B=16, state_dim=24, action_dim=8, layer_neurons=128, seed=1)

    # TODO(synk): checkpoint save/load and DataParallel from the base Network
    # class are host-side concerns, not kernel work.
    print("KERNEL_OK")
</pallas_src>

<mosaic_0001>
module attributes {stable_mosaic.version = 11 : i64} {
  func.func @critic_kernel(%arg0: i32, %arg1: memref<16x24xf32, #tpu.memory_space<vmem>>, %arg2: memref<16x8xf32, #tpu.memory_space<vmem>>, %arg3: memref<2x24x128xf32, #tpu.memory_space<vmem>>, %arg4: memref<2x128x128xf32, #tpu.memory_space<vmem>>, %arg5: memref<128x128xf32, #tpu.memory_space<vmem>>, %arg6: memref<1x128x128xf32, #tpu.memory_space<vmem>>, %arg7: memref<1x128x128xf32, #tpu.memory_space<vmem>>, %arg8: memref<7x1x128xf32, #tpu.memory_space<vmem>>, %arg9: memref<16x128xf32, #tpu.memory_space<vmem>>) attributes {dimension_semantics = [#tpu.dimension_semantics<parallel>], iteration_bounds = array<i64: 1>, scalar_prefetch = 0 : i64, scratch_operands = 0 : i64, tpu.core_type = #tpu.core_type<tc>, window_params = [{transform_indices = @transform_0, window_bounds = array<i64: 16, 24>}, {transform_indices = @transform_1, window_bounds = array<i64: 16, 8>}, {pipeline_mode = #tpu.pipeline_mode<synchronous>, transform_indices = @transform_2, window_bounds = array<i64: 2, 24, 128>}, {pipeline_mode = #tpu.pipeline_mode<synchronous>, transform_indices = @transform_3, window_bounds = array<i64: 2, 128, 128>}, {pipeline_mode = #tpu.pipeline_mode<synchronous>, transform_indices = @transform_4, window_bounds = array<i64: 128, 128>}, {pipeline_mode = #tpu.pipeline_mode<synchronous>, transform_indices = @transform_5, window_bounds = array<i64: 1, 128, 128>}, {pipeline_mode = #tpu.pipeline_mode<synchronous>, transform_indices = @transform_6, window_bounds = array<i64: 1, 128, 128>}, {pipeline_mode = #tpu.pipeline_mode<synchronous>, transform_indices = @transform_7, window_bounds = array<i64: 7, 1, 128>}, {transform_indices = @transform_8, window_bounds = array<i64: 16, 128>}]} {
    %c0 = arith.constant 0 : index
    %c0_0 = arith.constant 0 : index
    %0 = vector.load %arg1[%c0, %c0_0] : memref<16x24xf32, #tpu.memory_space<vmem>>, vector<16x24xf32>
    %c0_1 = arith.constant 0 : index
    %c0_2 = arith.constant 0 : index
    %1 = vector.load %arg2[%c0_1, %c0_2] : memref<16x8xf32, #tpu.memory_space<vmem>>, vector<16x8xf32>
    %c0_3 = arith.constant 0 : index
    %c0_4 = arith.constant 0 : index
    %c0_5 = arith.constant 0 : index
    %2 = vector.load %arg3[%c0_3, %c0_4, %c0_5] : memref<2x24x128xf32, #tpu.memory_space<vmem>>, vector<1x24x128xf32>
    %3 = vector.shape_cast %2 : vector<1x24x128xf32> to vector<24x128xf32>
    %cst = arith.constant dense<0.000000e+00> : vector<16x128xf32>
    %4 = tpu.matmul %0, %3, %cst {dimension_numbers = #tpu.dot_dimension_numbers<[1], [0], [0], [1], [0, 0, 1, 1], [], []>} : vector<16x24xf32>, vector<24x128xf32>, vector<16x128xf32> -> vector<16x128xf32>
    %c1 = arith.constant 1 : index
    %c0_6 = arith.constant 0 : index
    %c0_7 = arith.constant 0 : index
    %5 = vector.load %arg3[%c1, %c0_6, %c0_7] : memref<2x24x128xf32, #tpu.memory_space<vmem>>, vector<1x8x128xf32>
    %6 = vector.shape_cast %5 : vector<1x8x128xf32> to vector<8x128xf32>
    %cst_8 = arith.constant dense<0.000000e+00> : vector<16x128xf32>
    %7 = tpu.matmul %1, %6, %cst_8 {dimension_numbers = #tpu.dot_dimension_numbers<[1], [0], [0], [1], [0, 0, 1, 1], [], []>} : vector<16x8xf32>, vector<8x128xf32>, vector<16x128xf32> -> vector<16x128xf32>
    %8 = arith.addf %4, %7 : vector<16x128xf32>
    %c0_9 = arith.constant 0 : index
    %c0_10 = arith.constant 0 : index
    %c0_11 = arith.constant 0 : index
    %9 = vector.load %arg8[%c0_9, %c0_10, %c0_11] : memref<7x1x128xf32, #tpu.memory_space<vmem>>, vector<1x1x128xf32>
    %10 = vector.shape_cast %9 : vector<1x1x128xf32> to vector<1x128xf32>
    %11 = vector.broadcast %10 : vector<1x128xf32> to vector<16x128xf32>
    %12 = arith.addf %8, %11 : vector<16x128xf32>
    %cst_12 = arith.constant 5.000000e-01 : f32
    %13 = vector.broadcast %cst_12 : f32 to vector<16x128xf32>
    %14 = arith.mulf %13, %12 : vector<16x128xf32>
    %cst_13 = arith.constant 0.707106769 : f32
    %15 = vector.broadcast %cst_13 : f32 to vector<16x128xf32>
    %16 = arith.mulf %12, %15 : vector<16x128xf32>
    %17 = math.erf %16 : vector<16x128xf32>
    %cst_14 = arith.constant 1.000000e+00 : f32
    %18 = vector.broadcast %cst_14 : f32 to vector<16x128xf32>
    %19 = arith.addf %18, %17 : vector<16x128xf32>
    %20 = arith.mulf %14, %19 : vector<16x128xf32>
    %c0_15 = arith.constant 0 : index
    %c0_16 = arith.constant 0 : index
    %c0_17 = arith.constant 0 : index
    %21 = vector.load %arg4[%c0_15, %c0_16, %c0_17] : memref<2x128x128xf32, #tpu.memory_space<vmem>>, vector<1x128x128xf32>
    %22 = vector.shape_cast %21 : vector<1x128x128xf32> to vector<128x128xf32>
    %cst_18 = arith.constant dense<0.000000e+00> : vector<16x128xf32>
    %23 = tpu.matmul %20, %22, %cst_18 {dimension_numbers = #tpu.dot_dimension_numbers<[1], [0], [0], [1], [0, 0, 1, 1], [], []>} : vector<16x128xf32>, vector<128x128xf32>, vector<16x128xf32> -> vector<16x128xf32>
    %c1_19 = arith.constant 1 : index
    %c0_20 = arith.constant 0 : index
    %c0_21 = arith.constant 0 : index
    %24 = vector.load %arg8[%c1_19, %c0_20, %c0_21] : memref<7x1x128xf32, #tpu.memory_space<vmem>>, vector<1x1x128xf32>
    %25 = vector.shape_cast %24 : vector<1x1x128xf32> to vector<1x128xf32>
    %26 = vector.broadcast %25 : vector<1x128xf32> to vector<16x128xf32>
    %27 = arith.addf %23, %26 : vector<16x128xf32>
    %cst_22 = arith.constant 5.000000e-01 : f32
    %28 = vector.broadcast %cst_22 : f32 to vector<16x128xf32>
    %29 = arith.mulf %28, %27 : vector<16x128xf32>
    %cst_23 = arith.constant 0.707106769 : f32
    %30 = vector.broadcast %cst_23 : f32 to vector<16x128xf32>
    %31 = arith.mulf %27, %30 : vector<16x128xf32>
    %32 = math.erf %31 : vector<16x128xf32>
    %cst_24 = arith.constant 1.000000e+00 : f32
    %33 = vector.broadcast %cst_24 : f32 to vector<16x128xf32>
    %34 = arith.addf %33, %32 : vector<16x128xf32>
    %35 = arith.mulf %29, %34 : vector<16x128xf32>
    %c1_25 = arith.constant 1 : index
    %c0_26 = arith.constant 0 : index
    %c0_27 = arith.constant 0 : index
    %36 = vector.load %arg4[%c1_25, %c0_26, %c0_27] : memref<2x128x128xf32, #tpu.memory_space<vmem>>, vector<1x128x128xf32>
    %37 = vector.shape_cast %36 : vector<1x128x128xf32> to vector<128x128xf32>
    %cst_28 = arith.constant dense<0.000000e+00> : vector<16x128xf32>
    %38 = tpu.matmul %35, %37, %cst_28 {dimension_numbers = #tpu.dot_dimension_numbers<[1], [0], [0], [1], [0, 0, 1, 1], [], []>} : vector<16x128xf32>, vector<128x128xf32>, vector<16x128xf32> -> vector<16x128xf32>
    %c2 = arith.constant 2 : index
    %c0_29 = arith.constant 0 : index
    %c0_30 = arith.constant 0 : index
    %39 = vector.load %arg8[%c2, %c0_29, %c0_30] : memref<7x1x128xf32, #tpu.memory_space<vmem>>, vector<1x1x128xf32>
    %40 = vector.shape_cast %39 : vector<1x1x128xf32> to vector<1x128xf32>
    %41 = vector.broadcast %40 : vector<1x128xf32> to vector<16x128xf32>
    %42 = arith.addf %38, %41 : vector<16x128xf32>
    %cst_31 = arith.constant 5.000000e-01 : f32
    %43 = vector.broadcast %cst_31 : f32 to vector<16x128xf32>
    %44 = arith.mulf %43, %42 : vector<16x128xf32>
    %cst_32 = arith.constant 0.707106769 : f32
    %45 = vector.broadcast %cst_32 : f32 to vector<16x128xf32>
    %46 = arith.mulf %42, %45 : vector<16x128xf32>
    %47 = math.erf %46 : vector<16x128xf32>
    %cst_33 = arith.constant 1.000000e+00 : f32
    %48 = vector.broadcast %cst_33 : f32 to vector<16x128xf32>
    %49 = arith.addf %48, %47 : vector<16x128xf32>
    %50 = arith.mulf %44, %49 : vector<16x128xf32>
    %c0_34 = arith.constant 0 : index
    %c0_35 = arith.constant 0 : index
    %51 = vector.load %arg5[%c0_34, %c0_35] : memref<128x128xf32, #tpu.memory_space<vmem>>, vector<128x128xf32>
    %cst_36 = arith.constant dense<0.000000e+00> : vector<16x128xf32>
    %52 = tpu.matmul %50, %51, %cst_36 {dimension_numbers = #tpu.dot_dimension_numbers<[1], [0], [0], [1], [0, 0, 1, 1], [], []>} : vector<16x128xf32>, vector<128x128xf32>, vector<16x128xf32> -> vector<16x128xf32>
    %c3 = arith.constant 3 : index
    %c0_37 = arith.constant 0 : index
    %c0_38 = arith.constant 0 : index
    %53 = vector.load %arg8[%c3, %c0_37, %c0_38] : memref<7x1x128xf32, #tpu.memory_space<vmem>>, vector<1x1x128xf32>
    %54 = vector.shape_cast %53 : vector<1x1x128xf32> to vector<1x128xf32>
    %55 = vector.broadcast %54 : vector<1x128xf32> to vector<16x128xf32>
    %56 = arith.addf %52, %55 : vector<16x128xf32>
    %cst_39 = arith.constant 5.000000e-01 : f32
    %57 = vector.broadcast %cst_39 : f32 to vector<16x128xf32>
    %58 = arith.mulf %57, %56 : vector<16x128xf32>
    %cst_40 = arith.constant 0.707106769 : f32
    %59 = vector.broadcast %cst_40 : f32 to vector<16x128xf32>
    %60 = arith.mulf %56, %59 : vector<16x128xf32>
    %61 = math.erf %60 : vector<16x128xf32>
    %cst_41 = arith.constant 1.000000e+00 : f32
    %62 = vector.broadcast %cst_41 : f32 to vector<16x128xf32>
    %63 = arith.addf %62, %61 : vector<16x128xf32>
    %64 = arith.mulf %58, %63 : vector<16x128xf32>
    %c0_42 = arith.constant 0 : index
    %c0_43 = arith.constant 0 : index
    %c0_44 = arith.constant 0 : index
    %65 = vector.load %arg6[%c0_42, %c0_43, %c0_44] : memref<1x128x128xf32, #tpu.memory_space<vmem>>, vector<1x128x128xf32>
    %66 = vector.shape_cast %65 : vector<1x128x128xf32> to vector<128x128xf32>
    %cst_45 = arith.constant dense<0.000000e+00> : vector<16x128xf32>
    %67 = tpu.matmul %64, %66, %cst_45 {dimension_numbers = #tpu.dot_dimension_numbers<[1], [0], [0], [1], [0, 0, 1, 1], [], []>} : vector<16x128xf32>, vector<128x128xf32>, vector<16x128xf32> -> vector<16x128xf32>
    %c4 = arith.constant 4 : index
    %c0_46 = arith.constant 0 : index
    %c0_47 = arith.constant 0 : index
    %68 = vector.load %arg8[%c4, %c0_46, %c0_47] : memref<7x1x128xf32, #tpu.memory_space<vmem>>, vector<1x1x128xf32>
    %69 = vector.shape_cast %68 : vector<1x1x128xf32> to vector<1x128xf32>
    %70 = vector.broadcast %69 : vector<1x128xf32> to vector<16x128xf32>
    %71 = arith.addf %67, %70 : vector<16x128xf32>
    %cst_48 = arith.constant 5.000000e-01 : f32
    %72 = vector.broadcast %cst_48 : f32 to vector<16x128xf32>
    %73 = arith.mulf %72, %71 : vector<16x128xf32>
    %cst_49 = arith.constant 0.707106769 : f32
    %74 = vector.broadcast %cst_49 : f32 to vector<16x128xf32>
    %75 = arith.mulf %71, %74 : vector<16x128xf32>
    %76 = math.erf %75 : vector<16x128xf32>
    %cst_50 = arith.constant 1.000000e+00 : f32
    %77 = vector.broadcast %cst_50 : f32 to vector<16x128xf32>
    %78 = arith.addf %77, %76 : vector<16x128xf32>
    %79 = arith.mulf %73, %78 : vector<16x128xf32>
    %c0_51 = arith.constant 0 : index
    %c0_52 = arith.constant 0 : index
    %c0_53 = arith.constant 0 : index
    %80 = vector.load %arg7[%c0_51, %c0_52, %c0_53] : memref<1x128x128xf32, #tpu.memory_space<vmem>>, vector<1x128x128xf32>
    %81 = vector.shape_cast %80 : vector<1x128x128xf32> to vector<128x128xf32>
    %cst_54 = arith.constant dense<0.000000e+00> : vector<16x128xf32>
    %82 = tpu.matmul %79, %81, %cst_54 {dimension_numbers = #tpu.dot_dimension_numbers<[1], [0], [0], [1], [0, 0, 1, 1], [], []>} : vector<16x128xf32>, vector<128x128xf32>, vector<16x128xf32> -> vector<16x128xf32>
    %c6 = arith.constant 6 : index
    %c0_55 = arith.constant 0 : index
    %c0_56 = arith.constant 0 : index
    %83 = vector.load %arg8[%c6, %c0_55, %c0_56] : memref<7x1x128xf32, #tpu.memory_space<vmem>>, vector<1x1x128xf32>
    %84 = vector.shape_cast %83 : vector<1x1x128xf32> to vector<1x128xf32>
    %85 = vector.broadcast %84 : vector<1x128xf32> to vector<16x128xf32>
    %86 = arith.addf %82, %85 : vector<16x128xf32>
    %87 = tpu.iota {dimensions = array<i32: 1>} : vector<16x128xi32>
    %cst_57 = arith.constant -1.000000e-01 : f32
    %cst_58 = arith.constant 5.000000e+00 : f32
    %88 = vector.broadcast %cst_57 : f32 to vector<16x128xf32>
    %89 = arith.maximumf %88, %86 : vector<16x128xf32>
    %90 = vector.broadcast %cst_58 : f32 to vector<16x128xf32>
    %91 = arith.minimumf %90, %89 : vector<16x128xf32>
    %92 = math.exp %91 : vector<16x128xf32>
    %c1_i32 = arith.constant 1 : i32
    %93 = vector.broadcast %c1_i32 : i32 to vector<16x128xi32>
    %94 = arith.cmpi eq, %87, %93 : vector<16x128xi32>
    %95 = arith.select %94, %92, %86 : vector<16x128xi1>, vector<16x128xf32>
    %c0_59 = arith.constant 0 : index
    %c0_60 = arith.constant 0 : index
    %96 = vector.load %arg9[%c0_59, %c0_60] : memref<16x128xf32, #tpu.memory_space<vmem>>, vector<16x128xf32>
    tpu.vector_store %arg9[%c0_59, %c0_60], %95 {strides = array<i32>} : memref<16x128xf32, #tpu.memory_space<vmem>>, vector<16x128xf32>,
    return
  }
  func.func @transform_0(%arg0: i32) -> (i32, i32) {
    %c0_i32 = arith.constant 0 : i32
    %c0_i32_0 = arith.constant 0 : i32
    return %arg0, %c0_i32 : i32, i32
  }
  func.func @transform_1(%arg0: i32) -> (i32, i32) {
    %c0_i32 = arith.constant 0 : i32
    %c0_i32_0 = arith.constant 0 : i32
    return %arg0, %c0_i32 : i32, i32
  }
  func.func @transform_2(%arg0: i32) -> (i32, i32, i32) {
    %c0_i32 = arith.constant 0 : i32
    %c0_i32_0 = arith.constant 0 : i32
    %c0_i32_1 = arith.constant 0 : i32
    %c0_i32_2 = arith.constant 0 : i32
    return %c0_i32, %c0_i32_0, %c0_i32_1 : i32, i32, i32
  }
  func.func @transform_3(%arg0: i32) -> (i32, i32, i32) {
    %c0_i32 = arith.constant 0 : i32
    %c0_i32_0 = arith.constant 0 : i32
    %c0_i32_1 = arith.constant 0 : i32
    %c0_i32_2 = arith.constant 0 : i32
    return %c0_i32, %c0_i32_0, %c0_i32_1 : i32, i32, i32
  }
  func.func @transform_4(%arg0: i32) -> (i32, i32) {
    %c0_i32 = arith.constant 0 : i32
    %c0_i32_0 = arith.constant 0 : i32
    %c0_i32_1 = arith.constant 0 : i32
    return %c0_i32, %c0_i32_0 : i32, i32
  }
  func.func @transform_5(%arg0: i32) -> (i32, i32, i32) {
    %c0_i32 = arith.constant 0 : i32
    %c0_i32_0 = arith.constant 0 : i32
    %c0_i32_1 = arith.constant 0 : i32
    %c0_i32_2 = arith.constant 0 : i32
    return %c0_i32, %c0_i32_0, %c0_i32_1 : i32, i32, i32
  }
  func.func @transform_6(%arg0: i32) -> (i32, i32, i32) {
    %c0_i32 = arith.constant 0 : i32
    %c0_i32_0 = arith.constant 0 : i32
    %c0_i32_1 = arith.constant 0 : i32
    %c0_i32_2 = arith.constant 0 : i32
    return %c0_i32, %c0_i32_0, %c0_i32_1 : i32, i32, i32
  }
  func.func @transform_7(%arg0: i32) -> (i32, i32, i32) {
    %c0_i32 = arith.constant 0 : i32
    %c0_i32_0 = arith.constant 0 : i32
    %c0_i32_1 = arith.constant 0 : i32
    %c0_i32_2 = arith.constant 0 : i32
    return %c0_i32, %c0_i32_0, %c0_i32_1 : i32, i32, i32
  }
  func.func @transform_8(%arg0: i32) -> (i32, i32) {
    %c0_i32 = arith.constant 0 : i32
    %c0_i32_0 = arith.constant 0 : i32
    return %arg0, %c0_i32 : i32, i32
  }
}

</mosaic_0001>

<bundles_post_ra>
// kernel: tpu_custom_call.1
= control target key start
LH: loop header
LB: loop body
LE: loop exit
PB: predicated region body
PF: predicated region fallthrough
CT: control target
= control target key end

     0   :  { %13 = vsyncpa [#allocation3], 0  ;;  %s1834_s0 = inlined_call_operand.hbm [shape: f32[16,24], index: 0, kind: input, shape index: {}]   ;;  %s1835_s1 = inlined_call_operand.hbm [shape: f32[16,8], index: 1, kind: input, shape index: {}]   ;;  %s1836_s2 = inlined_call_operand.hbm [shape: f32[2,24,128], index: 2, kind: input, shape index: {}]   ;;  %s1837_s3 = inlined_call_operand.hbm [shape: f32[2,128,128], index: 3, kind: input, shape index: {}]   ;;  %s1838_s4 = inlined_call_operand.hbm [shape: f32[128,128], index: 4, kind: input, shape index: {}]   ;;  %s1839_s5 = inlined_call_operand.hbm [shape: f32[1,128,128], index: 5, kind: input, shape index: {}]   ;;  %s1840_s6 = inlined_call_operand.hbm [shape: f32[1,128,128], index: 6, kind: input, shape index: {}]   ;;  %s1841_s7 = inlined_call_operand.hbm [shape: f32[7,1,128], index: 7, kind: input, shape index: {}]   ;;  %s1842_s8 = inlined_call_operand.hbm [shape: f32[16,128], index: 8, kind: output, shape index: {}]  }
   0x1   :  { %14 = vsyncpa [#allocation6], 0 }
   0x2   :  { %15 = vsyncpa [#allocation9], 0 }
   0x3   :  { %16 = vsyncpa [#allocation12], 0 }
   0x4   :  { %17 = vsyncpa [#allocation15], 0 }
   0x5   :  { %18 = vsyncpa [#allocation4], 0  ;;  %s1613_s27 = smov [#allocation5]   ;;  %s1614_s29 = smov [#allocation8]  }
   0x6   :  { %s36_s28 = sshll.u32 %s1613_s27, 4  ;;  %s60_s30 = sshll.u32 %s1614_s29, 4  ;;  %s37_s28 = int_to_ptr.vmem [resolvable:$true] %s36_s28  ;;  %s1671_s30 = int_to_ptr.vmem [resolvable:$true] %s60_s30 }
   0x7   :  { %s1403_s11 = scalar_lea.hbm %s1835_s1, 256 }
   0x8   :  { %p1404_p0 = scmp.ne.s32.totalorder %s1835_s1, %s1403_s11  ;;  %p1407_p1 = scmp.lt.u32.totalorder %s1403_s11, %s1835_s1 }
   0xa   :  { %p1409_p2 = pnand %p1407_p1, %p1404_p0 }
   0xc   :  { %1412 = shalt.err (!%p1409_p2)
}
   0xd   :  { %s1413_s16 = scalar_lea.vmem %s37_s28, 256  ;;  %p1418_p4 = scmp.lt.s32.totalorder %s37_s28, %s37_s28 }
   0xe   :  { %p1414_p3 = scmp.ne.s32.totalorder %s37_s28, %s1413_s16  ;;  %p1419_p5 = scmp.lt.s32.totalorder %s1413_s16, %s1413_s16 }
  0x10   :  { %p1420_p6 = por %p1419_p5, %p1418_p4 }
  0x12   :  { %p1421_p7 = pnand %p1420_p6, %p1414_p3 }
  0x14   :  { %1424 = shalt.err (!%p1421_p7)
}
  0x15   :  { %s1615_s17 = smov 128   ;;  %s1616_s18 = smov 8  }
  0x16   :  { %42 = dma.hbm_to_vmem [thread:$0]  %s1835_s1, 256, %s37_s28, [#allocation6], %s1615_s17, %s1615_s17, %s1616_s18  }
  0x17   :  { %s1425_s23 = scalar_lea.hbm %s1837_s3, 4096 }
  0x18   :  { %p1426_p8 = scmp.ne.s32.totalorder %s1837_s3, %s1425_s23  ;;  %p1429_p9 = scmp.lt.u32.totalorder %s1425_s23, %s1837_s3 }
  0x1a   :  { %p1431_p10 = pnand %p1429_p9, %p1426_p8 }
  0x1c   :  { %1434 = shalt.err (!%p1431_p10)
}
  0x1d   :  { %s1435_s29 = scalar_lea.vmem %s1671_s30, 4096  ;;  %p1440_p12 = scmp.lt.s32.totalorder %s1671_s30, %s1671_s30 }
  0x1e   :  { %p1436_p11 = scmp.ne.s32.totalorder %s1671_s30, %s1435_s29  ;;  %p1441_p13 = scmp.lt.s32.totalorder %s1435_s29, %s1435_s29 }
  0x20   :  { %p1442_p0 = por %p1441_p13, %p1440_p12 }
  0x22   :  { %p1443_p1 = pnand %p1442_p0, %p1436_p11 }
  0x24   :  { %1446 = shalt.err (!%p1443_p1)
}
  0x25   :  { %66 = dma.hbm_to_vmem [thread:$0]  %s1837_s3, 4096, %s1671_s30, [#allocation9], %s1615_s17, %s1615_s17, %s1616_s18  }
  0x26   :  { %s1617_s9 = smov [#allocation11]   ;;  %s1618_s11 = smov [#allocation2]  }
  0x27   :  { %s84_s10 = sshll.u32 %s1617_s9, 4  ;;  %s24_s12 = sshll.u32 %s1618_s11, 4  ;;  %s85_s10 = int_to_ptr.vmem [resolvable:$true] %s84_s10  ;;  %s1708_s12 = int_to_ptr.vmem [resolvable:$true] %s24_s12 }
  0x28   :  { %s1447_s15 = scalar_lea.hbm %s1839_s5, 2048 }
  0x29   :  { %p1448_p2 = scmp.ne.s32.totalorder %s1839_s5, %s1447_s15  ;;  %p1451_p3 = scmp.lt.u32.totalorder %s1447_s15, %s1839_s5 }
  0x2b   :  { %p1453_p4 = pnand %p1451_p3, %p1448_p2 }
  0x2d   :  { %1456 = shalt.err (!%p1453_p4)
}
  0x2e   :  { %s1457_s3 = scalar_lea.vmem %s85_s10, 2048  ;;  %p1462_p6 = scmp.lt.s32.totalorder %s85_s10, %s85_s10 }
  0x2f   :  { %p1458_p5 = scmp.ne.s32.totalorder %s85_s10, %s1457_s3  ;;  %p1463_p7 = scmp.lt.s32.totalorder %s1457_s3, %s1457_s3 }
  0x31   :  { %p1464_p8 = por %p1463_p7, %p1462_p6 }
  0x33   :  { %p1465_p9 = pnand %p1464_p8, %p1458_p5 }
  0x35   :  { %1468 = shalt.err (!%p1465_p9)
}
  0x36   :  { %90 = dma.hbm_to_vmem [thread:$0]  %s1839_s5, 2048, %s85_s10, [#allocation12], %s1615_s17, %s1615_s17, %s1616_s18  }
  0x37   :  { %s1469_s25 = scalar_lea.hbm %s1834_s0, 256 }
  0x38   :  { %p1470_p10 = scmp.ne.s32.totalorder %s1834_s0, %s1469_s25  ;;  %p1473_p11 = scmp.lt.u32.totalorder %s1469_s25, %s1834_s0 }
  0x3a   :  { %p1475_p12 = pnand %p1473_p11, %p1470_p10 }
  0x3c   :  { %1478 = shalt.err (!%p1475_p12)
}
  0x3d   :  { %s1479_s28 = scalar_lea.vmem %s1708_s12, 256  ;;  %p1484_p0 = scmp.lt.s32.totalorder %s1708_s12, %s1708_s12 }
  0x3e   :  { %p1480_p13 = scmp.ne.s32.totalorder %s1708_s12, %s1479_s28  ;;  %p1485_p1 = scmp.lt.s32.totalorder %s1479_s28, %s1479_s28 }
  0x40   :  { %p1486_p2 = por %p1485_p1, %p1484_p0 }
  0x42   :  { %p1487_p3 = pnand %p1486_p2, %p1480_p13 }
  0x44   :  { %1490 = shalt.err (!%p1487_p3)
}
  0x45   :  { %30 = dma.hbm_to_vmem [thread:$0]  %s1834_s0, 256, %s1708_s12, [#allocation3], %s1615_s17, %s1615_s17, %s1616_s18  }
  0x46   :  { %s1619_s10 = smov [#allocation7]   ;;  %s1620_s13 = smov [#allocation10]  }
  0x47   :  { %s48_s11 = sshll.u32 %s1619_s10, 4  ;;  %s72_s14 = sshll.u32 %s1620_s13, 4  ;;  %s49_s11 = int_to_ptr.vmem [resolvable:$true] %s48_s11  ;;  %s1745_s14 = int_to_ptr.vmem [resolvable:$true] %s72_s14 }
  0x48   :  { %s1491_s19 = scalar_lea.hbm %s1836_s2, 768 }
  0x49   :  { %p1492_p4 = scmp.ne.s32.totalorder %s1836_s2, %s1491_s19  ;;  %p1495_p5 = scmp.lt.u32.totalorder %s1491_s19, %s1836_s2 }
  0x4b   :  { %p1497_p6 = pnand %p1495_p5, %p1492_p4 }
  0x4d   :  { %1500 = shalt.err (!%p1497_p6)
}
  0x4e   :  { %s1501_s0 = scalar_lea.vmem %s49_s11, 768  ;;  %p1506_p8 = scmp.lt.s32.totalorder %s49_s11, %s49_s11 }
  0x4f   :  { %p1502_p7 = scmp.ne.s32.totalorder %s49_s11, %s1501_s0  ;;  %p1507_p9 = scmp.lt.s32.totalorder %s1501_s0, %s1501_s0 }
  0x51   :  { %p1508_p10 = por %p1507_p9, %p1506_p8 }
  0x53   :  { %p1509_p11 = pnand %p1508_p10, %p1502_p7 }
  0x55   :  { %1512 = shalt.err (!%p1509_p11)
}
  0x56   :  { %54 = dma.hbm_to_vmem [thread:$0]  %s1836_s2, 768, %s49_s11, [#allocation6], %s1615_s17, %s1615_s17, %s1616_s18  }
  0x57   :  { %s1513_s25 = scalar_lea.hbm %s1838_s4, 2048 }
  0x58   :  { %p1514_p12 = scmp.ne.s32.totalorder %s1838_s4, %s1513_s25  ;;  %p1517_p13 = scmp.lt.u32.totalorder %s1513_s25, %s1838_s4 }
  0x5a   :  { %p1519_p0 = pnand %p1517_p13, %p1514_p12 }
  0x5c   :  { %1522 = shalt.err (!%p1519_p0)
}
  0x5d   :  { %s1523_s28 = scalar_lea.vmem %s1745_s14, 2048  ;;  %p1528_p2 = scmp.lt.s32.totalorder %s1745_s14, %s1745_s14 }
  0x5e   :  { %p1524_p1 = scmp.ne.s32.totalorder %s1745_s14, %s1523_s28  ;;  %p1529_p3 = scmp.lt.s32.totalorder %s1523_s28, %s1523_s28 }
  0x60   :  { %p1530_p4 = por %p1529_p3, %p1528_p2 }
  0x62   :  { %p1531_p5 = pnand %p1530_p4, %p1524_p1 }
  0x64   :  { %1534 = shalt.err (!%p1531_p5)
}
  0x65   :  { %78 = dma.hbm_to_vmem [thread:$0]  %s1838_s4, 2048, %s1745_s14, [#allocation9], %s1615_s17, %s1615_s17, %s1616_s18  }
  0x66   :  { %s1621_s9 = smov [#allocation13]   ;;  %s1622_s11 = smov [#allocation14]  }
  0x67   :  { %s96_s10 = sshll.u32 %s1621_s9, 4  ;;  %s108_s13 = sshll.u32 %s1622_s11, 4  ;;  %s97_s10 = int_to_ptr.vmem [resolvable:$true] %s96_s10  ;;  %s1782_s13 = int_to_ptr.vmem [resolvable:$true] %s108_s13 }
  0x68   :  { %s1535_s19 = scalar_lea.hbm %s1840_s6, 2048 }
  0x69   :  { %p1536_p6 = scmp.ne.s32.totalorder %s1840_s6, %s1535_s19  ;;  %p1539_p7 = scmp.lt.u32.totalorder %s1535_s19, %s1840_s6 }
  0x6b   :  { %p1541_p8 = pnand %p1539_p7, %p1536_p6 }
  0x6d   :  { %1544 = shalt.err (!%p1541_p8)
}
  0x6e   :  { %s1545_s4 = scalar_lea.vmem %s97_s10, 2048  ;;  %p1550_p10 = scmp.lt.s32.totalorder %s97_s10, %s97_s10 }
  0x6f   :  { %p1546_p9 = scmp.ne.s32.totalorder %s97_s10, %s1545_s4  ;;  %p1551_p11 = scmp.lt.s32.totalorder %s1545_s4, %s1545_s4 }
  0x71   :  { %p1552_p12 = por %p1551_p11, %p1550_p10 }
  0x73   :  { %p1553_p13 = pnand %p1552_p12, %p1546_p9 }
  0x75   :  { %1556 = shalt.err (!%p1553_p13)
}
  0x76   :  { %102 = dma.hbm_to_vmem [thread:$0]  %s1840_s6, 2048, %s97_s10, [#allocation12], %s1615_s17, %s1615_s17, %s1616_s18  }
  0x77   :  { %s1557_s23 = scalar_lea.hbm %s1841_s7, 112 }
  0x78   :  { %p1558_p0 = scmp.ne.s32.totalorder %s1841_s7, %s1557_s23  ;;  %p1561_p1 = scmp.lt.u32.totalorder %s1557_s23, %s1841_s7 }
  0x7a   :  { %p1563_p2 = pnand %p1561_p1, %p1558_p0 }
  0x7c   :  { %1566 = shalt.err (!%p1563_p2)
}
  0x7d   :  { %s1567_s29 = scalar_lea.vmem %s1782_s13, 112  ;;  %s1571_s6 = scalar_lea.vmem %s1782_s13, 128 }
  0x7e   :  { %p1568_p3 = scmp.ne.s32.totalorder %s1782_s13, %s1567_s29  ;;  %p1572_p4 = scmp.lt.s32.totalorder %s1782_s13, %s1782_s13 }
  0x7f   :  { %p1573_p5 = scmp.lt.s32.totalorder %s1571_s6, %s1567_s29 }
  0x81   :  { %p1574_p6 = por %p1573_p5, %p1572_p4 }
  0x83   :  { %p1575_p7 = pnand %p1574_p6, %p1568_p3 }
  0x85   :  { %1578 = shalt.err (!%p1575_p7)
}
  0x86   :  { %s1623_s1 = smov 16   ;;  %s1624_s28 = smov 1  }
  0x87   :  { %114 = dma.hbm_to_vmem [thread:$0]  %s1841_s7, 112, %s1782_s13, [#allocation15], %s1623_s1, %s1623_s1, %s1624_s28  }
  0x88   :  { %1601 = dma.done.wait [#allocation3], 256  }
  0x89   :  { %1602 = vsyncadd [#allocation3], 4294967040 }
  0x8a   :  { %1603 = dma.done.wait [#allocation6], 1024  }
  0x8b   :  { %1604 = vsyncadd [#allocation6], 4294966272 }
  0x8c   :  { %1605 = dma.done.wait [#allocation9], 6144  }
  0x8d   :  { %1606 = vsyncadd [#allocation9], 4294961152 }
  0x8e   :  { %1607 = dma.done.wait [#allocation12], 4096  }
  0x8f   :  { %1608 = vsyncadd [#allocation12], 4294963200 }
  0x90   :  { %1609 = dma.done.wait [#allocation15], 112  }
  0x91   :  { %1610 = vsyncadd [#allocation15], 4294967184  ;;  %vm148_vm0 = vcmask 64512   ;;  %v147_v0 = vld [vmem:[#allocation7 + $0x18] sm:$0xff]  ;;  %v141_v1 = vld [vmem:[#allocation5] sm:$0xff]  ;;  %vm230_vm1 = vcmask 195584  }
  0x92   :  { %v142_v2 = vld [vmem:[#allocation5 + $0x8] sm:$0xff]  ;;  %1011 = vmatprep.subr.mxu0 %v147_v0  ;;  %1013 = vmatprep.mubr.msk.f32.mxu0 %vm148_vm0, %v141_v1  ;;  %v143_v3 = vld [vmem:[#allocation7] sm:$0xff]  ;;  %v144_v4 = vld [vmem:[#allocation7 + $0x8] sm:$0xff]  ;;  %s1625_s7 = smov [#allocation16]  }
  0x93   :  { %1012 = vmatpush3.msra.mxu0 %v147_v0  ;;  %v1200_v5 = vpack.c.bf16 %v144_v4, %v143_v3  ;;  %v145_v6 = vld [vmem:[#allocation7 + $0x10] sm:$0xff]  ;;  %v139_v7 = vld [vmem:[#allocation2] sm:$0xff]  ;;  %v332_v9 = vld [vmem:[#allocation8 + $0x8] sm:$0xff]  ;;  %s887_s9 = sshll.u32 %s1625_s7, 4  ;;  %s888_s9 = int_to_ptr.vmem [resolvable:$true] %s887_s9 }
  0x94   :  { %v331_v8 = vld [vmem:[#allocation8] sm:$0xff]  ;;  %1014 = vmatmul.mubr.msk.f32.vlgmr.msra.gmra.mrb[0].mxu0 %vm148_vm0, %v142_v2  ;;  %v333_v10 = vld [vmem:[#allocation8 + $0x10] sm:$0xff]  ;;  %v334_v11 = vld [vmem:[#allocation8 + $0x18] sm:$0xff]  ;;  %s1579_s10 = scalar_lea.vmem %s888_s9, 256  ;;  %p1584_p9 = scmp.lt.s32.totalorder %s888_s9, %s888_s9 }
  0x95   :  { %1201 = vmatprep.subr.bf16.mxu0 %v1200_v5  ;;  %1022 = vmatprep.mubr.msk.f32.mxu0 %vm230_vm1, %v139_v7  ;;  %v1204_v12 = vpack.c.bf16 %v332_v9, %v331_v8  ;;  %v1208_v13 = vpack.c.bf16 %v334_v11, %v333_v10  ;;  %v335_v14 = vld [vmem:[#allocation8 + $0x20] sm:$0xff]  ;;  %v336_v15 = vld [vmem:[#allocation8 + $0x28] sm:$0xff]  ;;  %v140_v16 = vld [vmem:[#allocation2 + $0x8] sm:$0xff]  ;;  %p1580_p8 = scmp.ne.s32.totalorder %s888_s9, %s1579_s10  ;;  %p1585_p10 = scmp.lt.s32.totalorder %s1579_s10, %s1579_s10 }
  0x96   :  { %1203 = vmatpush3.bf16.msra.mxu0 %v1200_v5  ;;  %v1212_v17 = vpack.c.bf16 %v336_v15, %v335_v14  ;;  %v337_v18 = vld [vmem:[#allocation8 + $0x30] sm:$0xff]  ;;  %v338_v19 = vld [vmem:[#allocation8 + $0x38] sm:$0xff]  ;;  %v339_v21 = vld [vmem:[#allocation8 + $0x40] sm:$0xff] }
  0x97   :  { %1020 = vmatprep.subr.mxu0 %v145_v6  ;;  %1205 = vmatprep.subr.bf16.mxu1 %v1204_v12  ;;  %v1216_v20 = vpack.c.bf16 %v338_v19, %v337_v18  ;;  %v340_v22 = vld [vmem:[#allocation8 + $0x48] sm:$0xff]  ;;  %v341_v24 = vld [vmem:[#allocation8 + $0x50] sm:$0xff]  ;;  %v342_v25 = vld [vmem:[#allocation8 + $0x58] sm:$0xff]  ;;  %p1586_p11 = por %p1585_p10, %p1584_p9 }
  0x98   :  { %1207 = vmatpush3.bf16.msra.mxu1 %v1204_v12  ;;  %v1220_v23 = vpack.c.bf16 %v340_v22, %v339_v21  ;;  %v1224_v26 = vpack.c.bf16 %v342_v25, %v341_v24  ;;  %v343_v27 = vld [vmem:[#allocation8 + $0x60] sm:$0xff]  ;;  %v344_v28 = vld [vmem:[#allocation8 + $0x68] sm:$0xff]  ;;  %v345_v30 = vld [vmem:[#allocation8 + $0x70] sm:$0xff] }
  0x99   :  { %1209 = vmatprep.subr.bf16.mxu1 %v1208_v13  ;;  %v1228_v29 = vpack.c.bf16 %v344_v28, %v343_v27  ;;  %v346_v31 = vld [vmem:[#allocation8 + $0x78] sm:$0xff]  ;;  %v441_v33 = vld [vmem:[#allocation8 + $0x80] sm:$0xff]  ;;  %v442_v34 = vld [vmem:[#allocation8 + $0x88] sm:$0xff]  ;;  %p1587_p12 = pnand %p1586_p11, %p1580_p8 }
  0x9a   :  { %1021 = vmatpush3.msra.mxu0 %v145_v6  ;;  %v1232_v32 = vpack.c.bf16 %v346_v31, %v345_v30  ;;  %v443_v35 = vld [vmem:[#allocation8 + $0x90] sm:$0xff]  ;;  %v1236_v36 = vpack.c.bf16 %v442_v34, %v441_v33  ;;  %v444_v37 = vld [vmem:[#allocation8 + $0x98] sm:$0xff]  ;;  %v445_v39 = vld [vmem:[#allocation8 + $0xa0] sm:$0xff] }
  0x9b   :  { %v1240_v38 = vpack.c.bf16 %v444_v37, %v443_v35  ;;  %v446_v40 = vld [vmem:[#allocation8 + $0xa8] sm:$0xff]  ;;  %v907_v42 = vld [vmem:[#allocation14] ss:$0 sm:$0xff]  ;;  %v447_v57 = vld [vmem:[#allocation8 + $0xb0] sm:$0xff] }
  0x9c   :  { %1023 = vmatmul.mubr.msk.f32.vlgmr.msra.gmra.mrb[0].mxu0 %vm230_vm1, %v140_v16  ;;  %1211 = vmatpush3.bf16.msra.mxu1 %v1208_v13  ;;  %v1244_v41 = vpack.c.bf16 %v446_v40, %v445_v39  ;;  %v448_v58 = vld [vmem:[#allocation8 + $0xb8] sm:$0xff]  ;;  %v449_v60 = vld [vmem:[#allocation8 + $0xc0] sm:$0xff]  ;;  %v450_v61 = vld [vmem:[#allocation8 + $0xc8] sm:$0xff] }
  0x9d   :  { %1213 = vmatprep.subr.bf16.mxu1 %v1212_v17  ;;  %1237 = vmatprep.subr.bf16.mxu0 %v1236_v36  ;;  %v1248_v59 = vpack.c.bf16 %v448_v58, %v447_v57  ;;  %v1252_v62 = vpack.c.bf16 %v450_v61, %v449_v60  ;;  %v451_v63 = vld [vmem:[#allocation8 + $0xd0] sm:$0xff]  ;;  %v452_v0 = vld [vmem:[#allocation8 + $0xd8] sm:$0xff]  ;;  %v453_v2 = vld [vmem:[#allocation8 + $0xe0] sm:$0xff] }
  0x9e   :  { %1239 = vmatpush3.bf16.msra.mxu0 %v1236_v36  ;;  %v1256_v1 = vpack.c.bf16 %v452_v0, %v451_v63  ;;  %v454_v3 = vld [vmem:[#allocation8 + $0xe8] sm:$0xff]  ;;  %v455_v5 = vld [vmem:[#allocation8 + $0xf0] sm:$0xff]  ;;  %v456_v6 = vld [vmem:[#allocation8 + $0xf8] sm:$0xff] }
  0x9f   :  { %1241 = vmatprep.subr.bf16.mxu0 %v1240_v38  ;;  %v1260_v4 = vpack.c.bf16 %v454_v3, %v453_v2  ;;  %v1264_v7 = vpack.c.bf16 %v456_v6, %v455_v5  ;;  %v550_v8 = vld [vmem:[#allocation10] sm:$0xff]  ;;  %v551_v9 = vld [vmem:[#allocation10 + $0x8] sm:$0xff]  ;;  %v552_v10 = vld [vmem:[#allocation10 + $0x10] sm:$0xff] }
  0xa0   :  { %1215 = vmatpush3.bf16.msra.mxu1 %v1212_v17  ;;  %v1268_v11 = vpack.c.bf16 %v551_v9, %v550_v8  ;;  %v553_v12 = vld [vmem:[#allocation10 + $0x18] sm:$0xff]  ;;  %v554_v14 = vld [vmem:[#allocation10 + $0x20] sm:$0xff]  ;;  %v555_v15 = vld [vmem:[#allocation10 + $0x28] sm:$0xff] }
  0xa1   :  { %1217 = vmatprep.subr.bf16.mxu1 %v1216_v20  ;;  %v1272_v13 = vpack.c.bf16 %v553_v12, %v552_v10  ;;  %v1276_v16 = vpack.c.bf16 %v555_v15, %v554_v14  ;;  %v908_v17 = vld [vmem:[#allocation14 + $0x1] ss:$0 sm:$0xff]  ;;  %v557_v33 = vld [vmem:[#allocation10 + $0x38] sm:$0xff]  ;;  %v559_v36 = vld [vmem:[#allocation10 + $0x48] sm:$0xff] }
  0xa2   :  { %1243 = vmatpush3.bf16.msra.mxu0 %v1240_v38  ;;  %v558_v35 = vld [vmem:[#allocation10 + $0x40] sm:$0xff]  ;;  %v560_v38 = vld [vmem:[#allocation10 + $0x50] sm:$0xff]  ;;  %v561_v39 = vld [vmem:[#allocation10 + $0x58] sm:$0xff] }
  0xa3   :  { %1245 = vmatprep.subr.bf16.mxu0 %v1244_v41  ;;  %v1284_v37 = vpack.c.bf16 %v559_v36, %v558_v35  ;;  %v1288_v40 = vpack.c.bf16 %v561_v39, %v560_v38  ;;  %v666_v8 = vld [vmem:[#allocation11 + $0x38] sm:$0xff]  ;;  %v667_v10 = vld [vmem:[#allocation11 + $0x40] sm:$0xff] }
  0xa4   :  { %1219 = vmatpush3.bf16.msra.mxu1 %v1216_v20  ;;  %v670_v14 = vld [vmem:[#allocation11 + $0x58] sm:$0xff] }
  0xa5   :  { %1221 = vmatprep.subr.bf16.mxu1 %v1220_v23 }
  0xa6   :  { %1247 = vmatpush3.bf16.msra.mxu0 %v1244_v41  ;;  %v562_v41 = vld [vmem:[#allocation10 + $0x60] sm:$0xff] }
  0xa7   :  { %1249 = vmatprep.subr.bf16.mxu0 %v1248_v59 }
  0xa8   :  { %1223 = vmatpush3.bf16.msra.mxu1 %v1220_v23 }
  0xa9   :  { %1225 = vmatprep.subr.bf16.mxu1 %v1224_v26 }
  0xaa   :  { %1251 = vmatpush3.bf16.msra.mxu0 %v1248_v59 }
  0xab   :  { %1253 = vmatprep.subr.bf16.mxu0 %v1252_v62 }
  0xac   :  { %1227 = vmatpush3.bf16.msra.mxu1 %v1224_v26 }
  0xad   :  { %1229 = vmatprep.subr.bf16.mxu1 %v1228_v29 }
  0xae   :  { %1255 = vmatpush3.bf16.msra.mxu0 %v1252_v62 }
  0xaf   :  { %1257 = vmatprep.subr.bf16.mxu0 %v1256_v1 }
  0xb0   :  { %1231 = vmatpush3.bf16.msra.mxu1 %v1228_v29 }
  0xb1   :  { %1233 = vmatprep.subr.bf16.mxu1 %v1232_v32 }
  0xb2   :  { %1259 = vmatpush3.bf16.msra.mxu0 %v1256_v1 }
  0xb3   :  { %1261 = vmatprep.subr.bf16.mxu0 %v1260_v4 }
  0xb4   :  { %1235 = vmatpush3.bf16.msra.mxu1 %v1232_v32  ;;  %v556_v32 = vld [vmem:[#allocation10 + $0x30] sm:$0xff] }
  0xb5   :  { %1269 = vmatprep.subr.bf16.mxu1 %v1268_v11  ;;  %v1280_v34 = vpack.c.bf16 %v557_v33, %v556_v32 }
  0xb6   :  { %1263 = vmatpush3.bf16.msra.mxu0 %v1260_v4 }
  0xb7   :  { %1265 = vmatprep.subr.bf16.mxu0 %v1264_v7 }
  0xba   :  { %1267 = vmatpush3.bf16.msra.mxu0 %v1264_v7  ;;  %v665_v7 = vld [vmem:[#allocation11 + $0x30] sm:$0xff] }
  0xbb   :  { %v1312_v9 = vpack.c.bf16 %v666_v8, %v665_v7 }
 0x16f   :  { %v1024_v43 = vpop.f32.mrb[0].mxu0 }
 0x170   :  { %v320_v44 = vadd.f32 %v1024_v43, %v907_v42  ;;  %v303_v45 = vpop.f32.mrb[1].mxu0 }
 0x171   :  { %v319_v46 = vadd.f32 %v907_v42, %v303_v45  ;;  %v563_v42 = vld [vmem:[#allocation10 + $0x68] sm:$0xff]  ;;  %v565_v45 = vld [vmem:[#allocation10 + $0x78] sm:$0xff] }
 0x172   :  { %v324_v47 = vmul.f32 0.70710677, %v320_v44  ;;  %v322_v54 = vmul.f32 0.5, %v320_v44  ;;  %v1292_v43 = vpack.c.bf16 %v563_v42, %v562_v41  ;;  %v564_v44 = vld [vmem:[#allocation10 + $0x70] sm:$0xff] }
 0x173   :  { %v323_v48 = vmul.f32 0.70710677, %v319_v46  ;;  %v321_v52 = vmul.f32 0.5, %v319_v46  ;;  %v1296_v46 = vpack.c.bf16 %v565_v45, %v564_v44 }
 0x174   :  { %1379 = verf.f32 %v324_v47  ;;  %v659_v47 = vld [vmem:[#allocation11] sm:$0xff] }
 0x175   :  { %1381 = verf.f32 %v323_v48  ;;  %v660_v48 = vld [vmem:[#allocation11 + $0x8] sm:$0xff] }
 0x17e   :  { %v1380_v49 = vpop.eup %1379 }
 0x17f   :  { %v1382_v50 = vpop.eup %1381  ;;  %v328_v51 = vadd.f32 1.0, %v1380_v49  ;;  %v661_v49 = vld [vmem:[#allocation11 + $0x10] sm:$0xff] }
 0x180   :  { %v327_v53 = vadd.f32 1.0, %v1382_v50  ;;  %v1300_v50 = vpack.c.bf16 %v660_v48, %v659_v47  ;;  %v775_v47 = vld [vmem:[#allocation13 + $0x38] sm:$0xff] }
 0x181   :  { %v330_v56 = vmul.f32 %v328_v51, %v322_v54  ;;  %v662_v51 = vld [vmem:[#allocation11 + $0x18] sm:$0xff]  ;;  %v664_v54 = vld [vmem:[#allocation11 + $0x28] sm:$0xff] }
 0x182   :  { %v329_v55 = vmul.f32 %v327_v53, %v321_v52  ;;  %v1304_v52 = vpack.c.bf16 %v662_v51, %v661_v49  ;;  %v663_v53 = vld [vmem:[#allocation11 + $0x20] sm:$0xff]  ;;  %1301 = vmatprep.subr.bf16.mxu0 %v1300_v50 }
 0x183   :  { %v776_v49 = vld [vmem:[#allocation13 + $0x40] sm:$0xff] }
 0x184   :  { %1057 = vmatprep.mubr.f32.mxu1 %v329_v55  ;;  %v1308_v55 = vpack.c.bf16 %v664_v54, %v663_v53  ;;  %v779_v53 = vld [vmem:[#allocation13 + $0x58] sm:$0xff] }
 0x185   :  { %1058 = vmatmul.mubr.f32.vlgmr.msra.gmra.mrb[0].mxu1 %v330_v56  ;;  %v909_v56 = vld [vmem:[#allocation14 + $0x2] ss:$0 sm:$0xff] }
 0x186   :  { %1271 = vmatpush3.bf16.msra.mxu1 %v1268_v11  ;;  %v668_v11 = vld [vmem:[#allocation11 + $0x48] sm:$0xff] }
 0x187   :  { %1273 = vmatprep.subr.bf16.mxu1 %v1272_v13  ;;  %v1316_v12 = vpack.c.bf16 %v668_v11, %v667_v10 }
 0x18a   :  { %1275 = vmatpush3.bf16.msra.mxu1 %v1272_v13  ;;  %v669_v13 = vld [vmem:[#allocation11 + $0x50] sm:$0xff] }
 0x18b   :  { %1277 = vmatprep.subr.bf16.mxu1 %v1276_v16  ;;  %v1320_v15 = vpack.c.bf16 %v670_v14, %v669_v13 }
 0x18e   :  { %1279 = vmatpush3.bf16.msra.mxu1 %v1276_v16  ;;  %v671_v16 = vld [vmem:[#allocation11 + $0x60] sm:$0xff] }
 0x18f   :  { %1281 = vmatprep.subr.bf16.mxu1 %v1280_v34 }
 0x192   :  { %1283 = vmatpush3.bf16.msra.mxu1 %v1280_v34 }
 0x193   :  { %1285 = vmatprep.subr.bf16.mxu1 %v1284_v37 }
 0x196   :  { %1287 = vmatpush3.bf16.msra.mxu1 %v1284_v37 }
 0x197   :  { %1289 = vmatprep.subr.bf16.mxu1 %v1288_v40 }
 0x19a   :  { %1291 = vmatpush3.bf16.msra.mxu1 %v1288_v40 }
 0x19b   :  { %1293 = vmatprep.subr.bf16.mxu1 %v1292_v43 }
 0x19e   :  { %1295 = vmatpush3.bf16.msra.mxu1 %v1292_v43 }
 0x19f   :  { %1297 = vmatprep.subr.bf16.mxu1 %v1296_v46 }
 0x1a2   :  { %1299 = vmatpush3.bf16.msra.mxu1 %v1296_v46  ;;  %v774_v46 = vld [vmem:[#allocation13 + $0x30] sm:$0xff] }
 0x1a3   :  { %v1344_v48 = vpack.c.bf16 %v775_v47, %v774_v46 }
 0x258   :  { %v1059_v18 = vpop.f32.mrb[0].mxu1 }
 0x259   :  { %v427_v19 = vadd.f32 %v1059_v18, %v908_v17  ;;  %v421_v20 = vpop.f32.mrb[1].mxu1 }
 0x25a   :  { %v422_v21 = vadd.f32 %v908_v17, %v421_v20  ;;  %v672_v17 = vld [vmem:[#allocation11 + $0x68] sm:$0xff]  ;;  %v674_v20 = vld [vmem:[#allocation11 + $0x78] sm:$0xff] }
 0x25b   :  { %v433_v22 = vmul.f32 0.70710677, %v427_v19  ;;  %v431_v29 = vmul.f32 0.5, %v427_v19  ;;  %v1324_v18 = vpack.c.bf16 %v672_v17, %v671_v16  ;;  %v673_v19 = vld [vmem:[#allocation11 + $0x70] sm:$0xff] }
 0x25c   :  { %v432_v23 = vmul.f32 0.70710677, %v422_v21  ;;  %v430_v27 = vmul.f32 0.5, %v422_v21  ;;  %v1328_v21 = vpack.c.bf16 %v674_v20, %v673_v19 }
 0x25d   :  { %1383 = verf.f32 %v433_v22  ;;  %v768_v22 = vld [vmem:[#allocation13] sm:$0xff] }
 0x25e   :  { %1385 = verf.f32 %v432_v23  ;;  %v769_v23 = vld [vmem:[#allocation13 + $0x8] sm:$0xff] }
 0x267   :  { %v1384_v24 = vpop.eup %1383 }
 0x268   :  { %v1386_v25 = vpop.eup %1385  ;;  %v437_v26 = vadd.f32 1.0, %v1384_v24  ;;  %v770_v24 = vld [vmem:[#allocation13 + $0x10] sm:$0xff] }
 0x269   :  { %v436_v28 = vadd.f32 1.0, %v1386_v25  ;;  %v1332_v25 = vpack.c.bf16 %v769_v23, %v768_v22  ;;  %v867_v23 = vlaneseq }
 0x26a   :  { %v439_v31 = vmul.f32 %v437_v26, %v431_v29  ;;  %v771_v26 = vld [vmem:[#allocation13 + $0x18] sm:$0xff]  ;;  %v773_v29 = vld [vmem:[#allocation13 + $0x28] sm:$0xff] }
 0x26b   :  { %v438_v30 = vmul.f32 %v436_v28, %v430_v27  ;;  %v1336_v27 = vpack.c.bf16 %v771_v26, %v770_v24  ;;  %v772_v28 = vld [vmem:[#allocation13 + $0x20] sm:$0xff]  ;;  %1333 = vmatprep.subr.bf16.mxu1 %v1332_v25  ;;  %v868_v24 = vand.u32 127, %v867_v23 }
 0x26d   :  { %1092 = vmatprep.mubr.f32.mxu0 %v438_v30  ;;  %v1340_v30 = vpack.c.bf16 %v773_v29, %v772_v28  ;;  %vm877_vm2 = vcmp.eq.s32.totalorder %v868_v24, 1 }
 0x26e   :  { %1093 = vmatmul.mubr.f32.vlgmr.msra.gmra.mrb[2].mxu0 %v439_v31  ;;  %v910_v31 = vld [vmem:[#allocation14 + $0x3] ss:$0 sm:$0xff] }
 0x26f   :  { %1303 = vmatpush3.bf16.msra.mxu0 %v1300_v50  ;;  %v777_v50 = vld [vmem:[#allocation13 + $0x48] sm:$0xff] }
 0x270   :  { %1305 = vmatprep.subr.bf16.mxu0 %v1304_v52  ;;  %v1348_v51 = vpack.c.bf16 %v777_v50, %v776_v49 }
 0x273   :  { %1307 = vmatpush3.bf16.msra.mxu0 %v1304_v52  ;;  %v778_v52 = vld [vmem:[#allocation13 + $0x50] sm:$0xff] }
 0x274   :  { %1309 = vmatprep.subr.bf16.mxu0 %v1308_v55  ;;  %v1352_v54 = vpack.c.bf16 %v779_v53, %v778_v52 }
 0x277   :  { %1311 = vmatpush3.bf16.msra.mxu0 %v1308_v55  ;;  %v780_v55 = vld [vmem:[#allocation13 + $0x60] sm:$0xff] }
 0x278   :  { %1313 = vmatprep.subr.bf16.mxu0 %v1312_v9 }
 0x27b   :  { %1315 = vmatpush3.bf16.msra.mxu0 %v1312_v9 }
 0x27c   :  { %1317 = vmatprep.subr.bf16.mxu0 %v1316_v12 }
 0x27f   :  { %1319 = vmatpush3.bf16.msra.mxu0 %v1316_v12  ;;  %v912_v12 = vld [vmem:[#allocation14 + $0x6] ss:$0 sm:$0xff] }
 0x280   :  { %1321 = vmatprep.subr.bf16.mxu0 %v1320_v15 }
 0x283   :  { %1323 = vmatpush3.bf16.msra.mxu0 %v1320_v15 }
 0x284   :  { %1325 = vmatprep.subr.bf16.mxu0 %v1324_v18 }
 0x287   :  { %1327 = vmatpush3.bf16.msra.mxu0 %v1324_v18 }
 0x288   :  { %1329 = vmatprep.subr.bf16.mxu0 %v1328_v21 }
 0x28b   :  { %1331 = vmatpush3.bf16.msra.mxu0 %v1328_v21 }
 0x341   :  { %v1094_v57 = vpop.f32.mrb[2].mxu0 }
 0x342   :  { %v537_v58 = vadd.f32 %v1094_v57, %v909_v56  ;;  %v531_v59 = vpop.f32.mrb[3].mxu0 }
 0x343   :  { %v532_v60 = vadd.f32 %v909_v56, %v531_v59  ;;  %v781_v56 = vld [vmem:[#allocation13 + $0x68] sm:$0xff]  ;;  %v783_v59 = vld [vmem:[#allocation13 + $0x78] sm:$0xff] }
 0x344   :  { %v543_v61 = vmul.f32 0.70710677, %v537_v58  ;;  %v541_v4 = vmul.f32 0.5, %v537_v58  ;;  %v1356_v57 = vpack.c.bf16 %v781_v56, %v780_v55  ;;  %v782_v58 = vld [vmem:[#allocation13 + $0x70] sm:$0xff] }
 0x345   :  { %v542_v62 = vmul.f32 0.70710677, %v532_v60  ;;  %v540_v2 = vmul.f32 0.5, %v532_v60  ;;  %v1360_v60 = vpack.c.bf16 %v783_v59, %v782_v58 }
 0x346   :  { %1387 = verf.f32 %v543_v61  ;;  %v911_v61 = vld [vmem:[#allocation14 + $0x4] ss:$0 sm:$0xff] }
 0x347   :  { %1389 = verf.f32 %v542_v62 }
 0x350   :  { %v1388_v63 = vpop.eup %1387 }
 0x351   :  { %v1390_v0 = vpop.eup %1389  ;;  %v547_v1 = vadd.f32 1.0, %v1388_v63 }
 0x352   :  { %v546_v3 = vadd.f32 1.0, %v1390_v0 }
 0x353   :  { %v549_v6 = vmul.f32 %v547_v1, %v541_v4 }
 0x354   :  { %v548_v5 = vmul.f32 %v546_v3, %v540_v2 }
 0x356   :  { %1127 = vmatprep.mubr.f32.mxu1 %v548_v5 }
 0x357   :  { %1128 = vmatmul.mubr.f32.vlgmr.msra.gmra.mrb[2].mxu1 %v549_v6 }
 0x358   :  { %1335 = vmatpush3.bf16.msra.mxu1 %v1332_v25 }
 0x359   :  { %1337 = vmatprep.subr.bf16.mxu1 %v1336_v27 }
 0x35c   :  { %1339 = vmatpush3.bf16.msra.mxu1 %v1336_v27 }
 0x35d   :  { %1341 = vmatprep.subr.bf16.mxu1 %v1340_v30 }
 0x360   :  { %1343 = vmatpush3.bf16.msra.mxu1 %v1340_v30 }
 0x361   :  { %1345 = vmatprep.subr.bf16.mxu1 %v1344_v48 }
 0x364   :  { %1347 = vmatpush3.bf16.msra.mxu1 %v1344_v48 }
 0x365   :  { %1349 = vmatprep.subr.bf16.mxu1 %v1348_v51 }
 0x368   :  { %1351 = vmatpush3.bf16.msra.mxu1 %v1348_v51 }
 0x369   :  { %1353 = vmatprep.subr.bf16.mxu1 %v1352_v54 }
 0x36c   :  { %1355 = vmatpush3.bf16.msra.mxu1 %v1352_v54 }
 0x36d   :  { %1357 = vmatprep.subr.bf16.mxu1 %v1356_v57 }
 0x370   :  { %1359 = vmatpush3.bf16.msra.mxu1 %v1356_v57 }
 0x371   :  { %1361 = vmatprep.subr.bf16.mxu1 %v1360_v60 }
 0x374   :  { %1363 = vmatpush3.bf16.msra.mxu1 %v1360_v60 }
 0x42a   :  { %v1129_v32 = vpop.f32.mrb[2].mxu1 }
 0x42b   :  { %v646_v33 = vadd.f32 %v1129_v32, %v910_v31  ;;  %v640_v34 = vpop.f32.mrb[3].mxu1 }
 0x42c   :  { %v641_v35 = vadd.f32 %v910_v31, %v640_v34 }
 0x42d   :  { %v652_v36 = vmul.f32 0.70710677, %v646_v33  ;;  %v650_v43 = vmul.f32 0.5, %v646_v33 }
 0x42e   :  { %v651_v37 = vmul.f32 0.70710677, %v641_v35  ;;  %v649_v41 = vmul.f32 0.5, %v641_v35 }
 0x42f   :  { %1391 = verf.f32 %v652_v36 }
 0x430   :  { %1393 = verf.f32 %v651_v37 }
 0x439   :  { %v1392_v38 = vpop.eup %1391 }
 0x43a   :  { %v1394_v39 = vpop.eup %1393  ;;  %v656_v40 = vadd.f32 1.0, %v1392_v38 }
 0x43b   :  { %v655_v42 = vadd.f32 1.0, %v1394_v39 }
 0x43c   :  { %v658_v45 = vmul.f32 %v656_v40, %v650_v43 }
 0x43d   :  { %v657_v44 = vmul.f32 %v655_v42, %v649_v41 }
 0x43f   :  { %1162 = vmatprep.mubr.f32.mxu0 %v657_v44 }
 0x440   :  { %1163 = vmatmul.mubr.f32.vlgmr.msra.gmra.mrb[4].mxu0 %v658_v45 }
 0x513   :  { %v1164_v62 = vpop.f32.mrb[4].mxu0 }
 0x514   :  { %v755_v63 = vadd.f32 %v1164_v62, %v911_v61  ;;  %v749_v0 = vpop.f32.mrb[5].mxu0 }
 0x515   :  { %v750_v1 = vadd.f32 %v911_v61, %v749_v0 }
 0x516   :  { %v761_v2 = vmul.f32 0.70710677, %v755_v63  ;;  %v759_v9 = vmul.f32 0.5, %v755_v63 }
 0x517   :  { %v760_v3 = vmul.f32 0.70710677, %v750_v1  ;;  %v758_v7 = vmul.f32 0.5, %v750_v1 }
 0x518   :  { %1395 = verf.f32 %v761_v2 }
 0x519   :  { %1397 = verf.f32 %v760_v3 }
 0x522   :  { %v1396_v4 = vpop.eup %1395 }
 0x523   :  { %v1398_v5 = vpop.eup %1397  ;;  %v765_v6 = vadd.f32 1.0, %v1396_v4 }
 0x524   :  { %v764_v8 = vadd.f32 1.0, %v1398_v5 }
 0x525   :  { %v767_v11 = vmul.f32 %v765_v6, %v759_v9 }
 0x526   :  { %v766_v10 = vmul.f32 %v764_v8, %v758_v7 }
 0x528   :  { %1197 = vmatprep.mubr.f32.mxu1 %v766_v10 }
 0x529   :  { %1198 = vmatmul.mubr.f32.vlgmr.msra.gmra.mrb[4].mxu1 %v767_v11 }
 0x5fc   :  { %v1199_v13 = vpop.f32.mrb[4].mxu1 }
 0x5fd   :  { %v864_v14 = vadd.f32 %v1199_v13, %v912_v12  ;;  %v858_v15 = vpop.f32.mrb[5].mxu1 }
 0x5fe   :  { %v859_v16 = vadd.f32 %v912_v12, %v858_v15 }
 0x5ff   :  { %v870_v17 = vmax.f32 %v864_v14, -0.1 }
 0x600   :  { %v869_v18 = vmax.f32 %v859_v16, -0.1 }
 0x601   :  { %v872_v19 = vmin.f32 %v870_v17, 5.0 }
 0x602   :  { %v871_v20 = vmin.f32 %v869_v18, 5.0 }
 0x603   :  { %v875_v21 = vmul.f32 1.442695, %v872_v19 }
 0x604   :  { %v873_v22 = vmul.f32 1.442695, %v871_v20 }
 0x605   :  { %1399 = vpow2.f32 %v875_v21 }
 0x606   :  { %1401 = vpow2.f32 %v873_v22 }
 0x60f   :  { %v1400_v25 = vpop.eup %1399 }
 0x610   :  { %v1402_v26 = vpop.eup %1401  ;;  %v879_v27 = vsel %vm877_vm2, %v1400_v25, %v864_v14 }
 0x611   :  { %v878_v28 = vsel %vm877_vm2, %v1402_v26, %v859_v16  ;;  %881 = vst [vmem:[#allocation16 + $0x8] sm:$0xff] %v879_v27 }
 0x612   :  { %880 = vst [vmem:[#allocation16] sm:$0xff] %v878_v28 }
 0x613   :  { %1590 = shalt.err (!%p1587_p12)
}
 0x614   :  { %s1591_s15 = scalar_lea.hbm %s1842_s8, 256 }
 0x615   :  { %p1592_p13 = scmp.ne.s32.totalorder %s1842_s8, %s1591_s15  ;;  %p1595_p0 = scmp.lt.u32.totalorder %s1591_s15, %s1842_s8 }
 0x617   :  { %p1597_p1 = pnand %p1595_p0, %p1592_p13 }
 0x619   :  { %1600 = shalt.err (!%p1597_p1)
}
 0x61a   :  { %893 = dma.vmem_to_hbm [thread:$0]  %s888_s9, 256, %s1842_s8, [#allocation4], %s1615_s17, %s1615_s17, %s1616_s18  }
 0x61b   :  { %1611 = dma.done.wait [#allocation4], 256  }
 0x61c   :  { %1612 = vsyncadd [#allocation4], 4294967040 }
 0x61d   :  { %897 = vsyncpa [#allocation3], 1 }
 0x61e   :  { %898 = vsyncpa [#allocation6], 1 }
 0x61f   :  { %899 = vsyncpa [#allocation9], 1 }
 0x620   :  { %900 = vsyncpa [#allocation12], 1 }
 0x621   :  { %901 = vsyncpa [#allocation15], 1 }
 0x622   :  { %902 = vsyncpa [#allocation4], 1 }

</bundles_post_ra>
